<compile_context>
chip_gen: v5e
topology: v5e:2x2
jax: 0.10.0
libtpu: 0.0.40
codegen_flags: <defaults>
</compile_context>

<pallas_src>
import functools

import jax
import jax.numpy as jnp
from jax.experimental import pallas as pl
from jax.experimental.pallas import tpu as pltpu

EPS = 1e-5          # PyTorch BatchNorm1d default eps
LEAKY_SLOPE = 0.01  # PyTorch LeakyReLU default negative_slope


def _round_up(x, m):
    return (x + m - 1) // m * m


def _similarity(inv_temp, ehr, et, out_ref):
    """cosine-style ratio + the two exponentials (EUP: rsqrt, exp)."""
    dot = jnp.sum(ehr * et, axis=-1, keepdims=True)
    s1 = jnp.sum(ehr * ehr, axis=-1, keepdims=True)
    s2 = jnp.sum(et * et, axis=-1, keepdims=True)
    # rsqrt(s1) * rsqrt(s2) (not rsqrt(s1*s2)) to avoid f32 overflow of s1*s2.
    ratio = dot * (jax.lax.rsqrt(s1) * jax.lax.rsqrt(s2))
    out_ref[0] = (jnp.exp(ratio * inv_temp)
                  + jnp.exp(ratio * ratio * ratio * inv_temp))


def _sccf_kernel_relbias(inv_temp,
                         head_ref, relb_ref, tail_ref,
                         w1h_ref, w2_ref, b2_ref,
                         scale2_ref, shift2_ref,
                         out_ref):
    """Broadcast-relation path: relation folded into a per-batch bias."""
    head = head_ref[0]                                   # (TS, D) bf16
    h = jnp.dot(head, w1h_ref[...], preferred_element_type=jnp.float32)
    h = h + relb_ref[0]                                  # (1, HID) f32 bias
    h = jnp.maximum(h, LEAKY_SLOPE * h)                  # LeakyReLU (single vmax)

    # Linear(4D -> D) with BatchNorm1 (inference) folded into w2'/b2'.
    ehr = jnp.dot(h.astype(jnp.bfloat16), w2_ref[...],
                  preferred_element_type=jnp.float32) + b2_ref[...]

    # tail_transform BatchNorm1d (inference) as a single scale/shift FMA.
    et = tail_ref[0] * scale2_ref[...] + shift2_ref[...]
    _similarity(inv_temp, ehr, et, out_ref)


def _sccf_kernel_fullrel(inv_temp,
                         head_ref, rel_ref, tail_ref,
                         w1_ref, b1_ref, w2_ref, b2_ref,
                         scale2_ref, shift2_ref,
                         out_ref):
    """Full-seq relation path: fused K=2D first-layer matmul."""
    hr = jnp.concatenate([head_ref[0], rel_ref[0]], axis=-1)   # (TS, 2D) bf16
    h = jnp.dot(hr, w1_ref[...], preferred_element_type=jnp.float32) + b1_ref[...]
    h = jnp.maximum(h, LEAKY_SLOPE * h)

    ehr = jnp.dot(h.astype(jnp.bfloat16), w2_ref[...],
                  preferred_element_type=jnp.float32) + b2_ref[...]

    et = tail_ref[0] * scale2_ref[...] + shift2_ref[...]
    _similarity(inv_temp, ehr, et, out_ref)


def prepare_params(params):
    """One-time weight folding / transposes / bf16 casts (hot-path free)."""
    D = params["w2"].shape[0]
    HID = params["w1"].shape[0]

    # Fold BatchNorm1 (inference) into Linear2.
    scale1 = params["bn1_gamma"] * jax.lax.rsqrt(params["bn1_var"] + EPS)
    w2_t = (params["w2"] * scale1[:, None]).T.astype(jnp.bfloat16)     # (HID, D)
    b2 = ((params["b2"] - params["bn1_mean"]) * scale1
          + params["bn1_beta"]).astype(jnp.float32).reshape(1, D)

    # BatchNorm2 (inference) as per-feature scale/shift.
    scale2 = (params["bn2_gamma"] * jax.lax.rsqrt(params["bn2_var"] + EPS)
              ).astype(jnp.float32).reshape(1, D)
    shift2 = (params["bn2_beta"].reshape(1, D)
              - params["bn2_mean"].reshape(1, D) * scale2).astype(jnp.float32)

    # First Linear weight, transposed; split into head / relation halves.
    w1_t = params["w1"].T.astype(jnp.bfloat16)                          # (2D, HID)
    b1 = params["b1"].astype(jnp.float32).reshape(1, HID)

    return dict(w1_t=w1_t, w1h_t=w1_t[:D], w1r_t=w1_t[D:], b1=b1,
                w2_t=w2_t, b2=b2, scale2=scale2, shift2=shift2)


def sccf_reverse_forward(head, relation, tail, prepared, temperature=0.5,
                         tile_s=512):
    """head: (B, S, D); relation: (B, 1, D) or (B, S, D); tail: (B, S, D)."""
    B, S, D = head.shape
    R = relation.shape[1]
    assert R in (1, S), "relation seq length must be 1 or match head"
    HID = prepared["b1"].shape[1]

    # Seq tiling: multiple of 8 (sublane rule); partial last block is masked
    # by Pallas, no jnp.pad / output slice needed.
    ts = min(tile_s, _round_up(S, 8))
    n_s = pl.cdiv(S, ts)

    head = head.astype(jnp.bfloat16)      # bf16 HBM storage (fed MXU anyway)
    tail = tail.astype(jnp.float32)

    row3 = lambda b, s: (b, s, 0)
    const2 = lambda b, s: (0, 0)          # resident params: same block always
    inv_temp = float(1.0 / temperature)

    common_specs = [
        pl.BlockSpec((HID, D), const2),   # w2' (BN1 folded), resident
        pl.BlockSpec((1, D), const2),     # b2'
        pl.BlockSpec((1, D), const2),     # bn2 scale
        pl.BlockSpec((1, D), const2),     # bn2 shift
    ]
    out_shape = jax.ShapeDtypeStruct((B, S, 1), jnp.float32)
    # Lane-width-1 output: bytes are negligible (4*ts per tile) -> left as-is.
    out_spec = pl.BlockSpec((1, ts, 1), row3)
    compiler_params = pltpu.CompilerParams(
        dimension_semantics=("parallel", "parallel"),
        vmem_limit_bytes=32 * 1024 * 1024)

    if R == 1:
        # Hoist the relation contribution of Linear1 into a per-batch bias.
        rel_bias = (jnp.dot(relation.reshape(B, D).astype(jnp.bfloat16),
                            prepared["w1r_t"],
                            preferred_element_type=jnp.float32)
                    + prepared["b1"]).reshape(B, 1, HID)
        out = pl.pallas_call(
            functools.partial(_sccf_kernel_relbias, inv_temp),
            out_shape=out_shape,
            grid=(B, n_s),
            in_specs=[
                pl.BlockSpec((1, ts, D), row3),                      # head (bf16)
                pl.BlockSpec((1, 1, HID), lambda b, s: (b, 0, 0)),   # rel bias
                pl.BlockSpec((1, ts, D), row3),                      # tail (f32)
                pl.BlockSpec((D, HID), const2),                      # w1_head^T
            ] + common_specs,
            out_specs=out_spec,
            compiler_params=compiler_params,
        )(head, rel_bias, tail,
          prepared["w1h_t"], prepared["w2_t"], prepared["b2"],
          prepared["scale2"], prepared["shift2"])
    else:
        relation = relation.astype(jnp.bfloat16)
        out = pl.pallas_call(
            functools.partial(_sccf_kernel_fullrel, inv_temp),
            out_shape=out_shape,
            grid=(B, n_s),
            in_specs=[
                pl.BlockSpec((1, ts, D), row3),                      # head (bf16)
                pl.BlockSpec((1, ts, D), row3),                      # rel  (bf16)
                pl.BlockSpec((1, ts, D), row3),                      # tail (f32)
                pl.BlockSpec((2 * D, HID), const2),                  # w1^T
                pl.BlockSpec((1, HID), const2),                      # b1
            ] + common_specs,
            out_specs=out_spec,
            compiler_params=compiler_params,
        )(head, relation, tail,
          prepared["w1_t"], prepared["b1"], prepared["w2_t"], prepared["b2"],
          prepared["scale2"], prepared["shift2"])

    return out[:, :, 0]


def reference_forward(head, relation, tail, params, temperature=0.5):
    """Literal f32 re-implementation of the PyTorch module (inference BN)."""
    B, S, D = head.shape
    if relation.shape[1] != S:
        relation = jnp.broadcast_to(relation, (B, S, relation.shape[2]))
    x = jnp.concatenate([head, relation], axis=2).reshape(B * S, -1)
    h = x @ params["w1"].T + params["b1"]
    h = jnp.where(h >= 0.0, h, LEAKY_SLOPE * h)
    h2 = h @ params["w2"].T + params["b2"]
    ehr = ((h2 - params["bn1_mean"]) / jnp.sqrt(params["bn1_var"] + EPS)
           * params["bn1_gamma"] + params["bn1_beta"])
    t = tail.reshape(B * S, D)
    et = ((t - params["bn2_mean"]) / jnp.sqrt(params["bn2_var"] + EPS)
          * params["bn2_gamma"] + params["bn2_beta"])
    dot = jnp.sum(ehr * et, axis=-1)
    norm = jnp.linalg.norm(ehr, axis=-1) * jnp.linalg.norm(et, axis=-1)
    sim = jnp.exp(dot / (temperature * norm)) + jnp.exp((dot / norm) ** 3 / temperature)
    return sim.reshape(B, S)


if __name__ == "__main__":
    # Small shapes consistent with the module (teacher_embedding_dim -> D,
    # hidden = (entity_dim + relation_dim) * layer_mul).
    B, S, D = 2, 8, 128
    HID = (D + D) * 2
    temperature = 0.5

    key = jax.random.PRNGKey(0)
    ks = jax.random.split(key, 17)

    head = 0.1 * jax.random.normal(ks[0], (B, S, D), jnp.float32)
    relation_bcast = 0.1 * jax.random.normal(ks[1], (B, 1, D), jnp.float32)
    relation_full = 0.1 * jax.random.normal(ks[15], (B, S, D), jnp.float32)
    tail = 0.1 * jax.random.normal(ks[2], (B, S, D), jnp.float32)

    params = {
        "w1": 0.02 * jax.random.normal(ks[3], (HID, 2 * D), jnp.float32),   # MLP[0].weight
        "b1": 0.01 * jax.random.normal(ks[4], (HID,), jnp.float32),
        "w2": 0.02 * jax.random.normal(ks[5], (D, HID), jnp.float32),       # MLP[2].weight
        "b2": 0.01 * jax.random.normal(ks[6], (D,), jnp.float32),
        "bn1_gamma": 1.0 + 0.1 * jax.random.normal(ks[7], (D,), jnp.float32),
        "bn1_beta": 0.01 * jax.random.normal(ks[8], (D,), jnp.float32),
        "bn1_mean": 0.05 * jax.random.normal(ks[9], (D,), jnp.float32),
        "bn1_var": jax.random.uniform(ks[10], (D,), jnp.float32, 0.5, 1.5),
        "bn2_gamma": 1.0 + 0.1 * jax.random.normal(ks[11], (D,), jnp.float32),
        "bn2_beta": 0.01 * jax.random.normal(ks[12], (D,), jnp.float32),
        "bn2_mean": 0.05 * jax.random.normal(ks[13], (D,), jnp.float32),
        "bn2_var": jax.random.uniform(ks[14], (D,), jnp.float32, 0.5, 1.5),
    }

    prepared = prepare_params(params)   # hoisted out of the hot path

    # Broadcast-relation path (er seq length 1, folded into per-batch bias).
    sim1 = sccf_reverse_forward(head, relation_bcast, tail, prepared, temperature)
    jax.block_until_ready(sim1)
    ref1 = reference_forward(head, relation_bcast, tail, params, temperature)
    assert sim1.shape == (B, S)
    # bf16 MXU matmuls with f32 accumulation vs f32 reference -> loose tolerance.
    assert jnp.allclose(sim1, ref1, rtol=4e-2, atol=4e-3), (sim1, ref1)

    # Full-seq relation path (fused K=2D first-layer matmul).
    sim2 = sccf_reverse_forward(head, relation_full, tail, prepared, temperature)
    jax.block_until_ready(sim2)
    ref2 = reference_forward(head, relation_full, tail, params, temperature)
    assert sim2.shape == (B, S)
    assert jnp.allclose(sim2, ref2, rtol=4e-2, atol=4e-3), (sim2, ref2)

    print("KERNEL_OK")
</pallas_src>

<mosaic_0001>
module attributes {stable_mosaic.version = 11 : i64} {
  func.func @_sccf_kernel_relbias(%arg0: i32, %arg1: i32, %arg2: memref<1x8x128xbf16, #tpu.memory_space<vmem>>, %arg3: memref<1x1x512xf32, #tpu.memory_space<vmem>>, %arg4: memref<1x8x128xf32, #tpu.memory_space<vmem>>, %arg5: memref<128x512xbf16, #tpu.memory_space<vmem>>, %arg6: memref<512x128xbf16, #tpu.memory_space<vmem>>, %arg7: memref<1x128xf32, #tpu.memory_space<vmem>>, %arg8: memref<1x128xf32, #tpu.memory_space<vmem>>, %arg9: memref<1x128xf32, #tpu.memory_space<vmem>>, %arg10: memref<1x8x1xf32, #tpu.memory_space<vmem>>) attributes {dimension_semantics = [#tpu.dimension_semantics<parallel>, #tpu.dimension_semantics<parallel>], iteration_bounds = array<i64: 2, 1>, scalar_prefetch = 0 : i64, scratch_operands = 0 : i64, tpu.core_type = #tpu.core_type<tc>, window_params = [{transform_indices = @transform_0, window_bounds = array<i64: 1, 8, 128>}, {transform_indices = @transform_1, window_bounds = array<i64: 1, 1, 512>}, {transform_indices = @transform_2, window_bounds = array<i64: 1, 8, 128>}, {pipeline_mode = #tpu.pipeline_mode<synchronous>, transform_indices = @transform_3, window_bounds = array<i64: 128, 512>}, {pipeline_mode = #tpu.pipeline_mode<synchronous>, transform_indices = @transform_4, window_bounds = array<i64: 512, 128>}, {pipeline_mode = #tpu.pipeline_mode<synchronous>, transform_indices = @transform_5, window_bounds = array<i64: 1, 128>}, {pipeline_mode = #tpu.pipeline_mode<synchronous>, transform_indices = @transform_6, window_bounds = array<i64: 1, 128>}, {pipeline_mode = #tpu.pipeline_mode<synchronous>, transform_indices = @transform_7, window_bounds = array<i64: 1, 128>}, {transform_indices = @transform_8, window_bounds = array<i64: 1, 8, 1>}]} {
    %c0 = arith.constant 0 : index
    %c0_0 = arith.constant 0 : index
    %c0_1 = arith.constant 0 : index
    %0 = vector.load %arg2[%c0, %c0_0, %c0_1] : memref<1x8x128xbf16, #tpu.memory_space<vmem>>, vector<1x8x128xbf16>
    %1 = vector.shape_cast %0 : vector<1x8x128xbf16> to vector<8x128xbf16>
    %c0_2 = arith.constant 0 : index
    %c0_3 = arith.constant 0 : index
    %2 = vector.load %arg5[%c0_2, %c0_3] : memref<128x512xbf16, #tpu.memory_space<vmem>>, vector<128x512xbf16>
    %cst = arith.constant dense<0.000000e+00> : vector<8x512xf32>
    %3 = tpu.matmul %1, %2, %cst {dimension_numbers = #tpu.dot_dimension_numbers<[1], [0], [0], [1], [0, 0, 1, 1], [], []>} : vector<8x128xbf16>, vector<128x512xbf16>, vector<8x512xf32> -> vector<8x512xf32>
    %c0_4 = arith.constant 0 : index
    %c0_5 = arith.constant 0 : index
    %c0_6 = arith.constant 0 : index
    %4 = vector.load %arg3[%c0_4, %c0_5, %c0_6] : memref<1x1x512xf32, #tpu.memory_space<vmem>>, vector<1x1x512xf32>
    %5 = vector.shape_cast %4 : vector<1x1x512xf32> to vector<1x512xf32>
    %6 = vector.broadcast %5 : vector<1x512xf32> to vector<8x512xf32>
    %7 = arith.addf %3, %6 : vector<8x512xf32>
    %cst_7 = arith.constant 0.00999999977 : f32
    %8 = vector.broadcast %cst_7 : f32 to vector<8x512xf32>
    %9 = arith.mulf %8, %7 : vector<8x512xf32>
    %10 = arith.maximumf %7, %9 : vector<8x512xf32>
    %11 = arith.truncf %10 : vector<8x512xf32> to vector<8x512xbf16>
    %c0_8 = arith.constant 0 : index
    %c0_9 = arith.constant 0 : index
    %12 = vector.load %arg6[%c0_8, %c0_9] : memref<512x128xbf16, #tpu.memory_space<vmem>>, vector<512x128xbf16>
    %cst_10 = arith.constant dense<0.000000e+00> : vector<8x128xf32>
    %13 = tpu.matmul %11, %12, %cst_10 {dimension_numbers = #tpu.dot_dimension_numbers<[1], [0], [0], [1], [0, 0, 1, 1], [], []>} : vector<8x512xbf16>, vector<512x128xbf16>, vector<8x128xf32> -> vector<8x128xf32>
    %c0_11 = arith.constant 0 : index
    %c0_12 = arith.constant 0 : index
    %14 = vector.load %arg7[%c0_11, %c0_12] : memref<1x128xf32, #tpu.memory_space<vmem>>, vector<1x128xf32>
    %15 = vector.broadcast %14 : vector<1x128xf32> to vector<8x128xf32>
    %16 = arith.addf %13, %15 : vector<8x128xf32>
    %c0_13 = arith.constant 0 : index
    %c0_14 = arith.constant 0 : index
    %c0_15 = arith.constant 0 : index
    %17 = vector.load %arg4[%c0_13, %c0_14, %c0_15] : memref<1x8x128xf32, #tpu.memory_space<vmem>>, vector<1x8x128xf32>
    %18 = vector.shape_cast %17 : vector<1x8x128xf32> to vector<8x128xf32>
    %c0_16 = arith.constant 0 : index
    %c0_17 = arith.constant 0 : index
    %19 = vector.load %arg8[%c0_16, %c0_17] : memref<1x128xf32, #tpu.memory_space<vmem>>, vector<1x128xf32>
    %20 = vector.broadcast %19 : vector<1x128xf32> to vector<8x128xf32>
    %21 = arith.mulf %18, %20 : vector<8x128xf32>
    %c0_18 = arith.constant 0 : index
    %c0_19 = arith.constant 0 : index
    %22 = vector.load %arg9[%c0_18, %c0_19] : memref<1x128xf32, #tpu.memory_space<vmem>>, vector<1x128xf32>
    %23 = vector.broadcast %22 : vector<1x128xf32> to vector<8x128xf32>
    %24 = arith.addf %21, %23 : vector<8x128xf32>
    %25 = arith.mulf %16, %24 : vector<8x128xf32>
    %cst_20 = arith.constant dense<0.000000e+00> : vector<8xf32>
    %26 = vector.multi_reduction <add>, %25, %cst_20 [1] : vector<8x128xf32> to vector<8xf32>
    %27 = vector.shape_cast %26 : vector<8xf32> to vector<8x1xf32>
    %28 = arith.mulf %16, %16 : vector<8x128xf32>
    %cst_21 = arith.constant dense<0.000000e+00> : vector<8xf32>
    %29 = vector.multi_reduction <add>, %28, %cst_21 [1] : vector<8x128xf32> to vector<8xf32>
    %30 = vector.shape_cast %29 : vector<8xf32> to vector<8x1xf32>
    %31 = arith.mulf %24, %24 : vector<8x128xf32>
    %cst_22 = arith.constant dense<0.000000e+00> : vector<8xf32>
    %32 = vector.multi_reduction <add>, %31, %cst_22 [1] : vector<8x128xf32> to vector<8xf32>
    %33 = vector.shape_cast %32 : vector<8xf32> to vector<8x1xf32>
    %34 = math.rsqrt %30 : vector<8x1xf32>
    %35 = math.rsqrt %33 : vector<8x1xf32>
    %36 = arith.mulf %34, %35 : vector<8x1xf32>
    %37 = arith.mulf %27, %36 : vector<8x1xf32>
    %cst_23 = arith.constant 2.000000e+00 : f32
    %38 = vector.broadcast %cst_23 : f32 to vector<8x1xf32>
    %39 = arith.mulf %37, %38 : vector<8x1xf32>
    %40 = math.exp %39 : vector<8x1xf32>
    %41 = arith.mulf %37, %37 : vector<8x1xf32>
    %42 = arith.mulf %41, %37 : vector<8x1xf32>
    %cst_24 = arith.constant 2.000000e+00 : f32
    %43 = vector.broadcast %cst_24 : f32 to vector<8x1xf32>
    %44 = arith.mulf %42, %43 : vector<8x1xf32>
    %45 = math.exp %44 : vector<8x1xf32>
    %46 = arith.addf %40, %45 : vector<8x1xf32>
    %c0_25 = arith.constant 0 : index
    %c0_26 = arith.constant 0 : index
    %c0_27 = arith.constant 0 : index
    %47 = vector.load %arg10[%c0_25, %c0_26, %c0_27] : memref<1x8x1xf32, #tpu.memory_space<vmem>>, vector<1x8x1xf32>
    %48 = vector.shape_cast %47 : vector<1x8x1xf32> to vector<8x1xf32>
    %49 = vector.shape_cast %46 : vector<8x1xf32> to vector<1x8x1xf32>
    tpu.vector_store %arg10[%c0_25, %c0_26, %c0_27], %49 {strides = array<i32>} : memref<1x8x1xf32, #tpu.memory_space<vmem>>, vector<1x8x1xf32>,
    return
  }
  func.func @transform_0(%arg0: i32, %arg1: i32) -> (i32, i32, i32) {
    %c0_i32 = arith.constant 0 : i32
    %c0_i32_0 = arith.constant 0 : i32
    return %arg0, %arg1, %c0_i32 : i32, i32, i32
  }
  func.func @transform_1(%arg0: i32, %arg1: i32) -> (i32, i32, i32) {
    %c0_i32 = arith.constant 0 : i32
    %c0_i32_0 = arith.constant 0 : i32
    %c0_i32_1 = arith.constant 0 : i32
    return %arg0, %c0_i32, %c0_i32_0 : i32, i32, i32
  }
  func.func @transform_2(%arg0: i32, %arg1: i32) -> (i32, i32, i32) {
    %c0_i32 = arith.constant 0 : i32
    %c0_i32_0 = arith.constant 0 : i32
    return %arg0, %arg1, %c0_i32 : i32, i32, i32
  }
  func.func @transform_3(%arg0: i32, %arg1: i32) -> (i32, i32) {
    %c0_i32 = arith.constant 0 : i32
    %c0_i32_0 = arith.constant 0 : i32
    %c0_i32_1 = arith.constant 0 : i32
    return %c0_i32, %c0_i32_0 : i32, i32
  }
  func.func @transform_4(%arg0: i32, %arg1: i32) -> (i32, i32) {
    %c0_i32 = arith.constant 0 : i32
    %c0_i32_0 = arith.constant 0 : i32
    %c0_i32_1 = arith.constant 0 : i32
    return %c0_i32, %c0_i32_0 : i32, i32
  }
  func.func @transform_5(%arg0: i32, %arg1: i32) -> (i32, i32) {
    %c0_i32 = arith.constant 0 : i32
    %c0_i32_0 = arith.constant 0 : i32
    %c0_i32_1 = arith.constant 0 : i32
    return %c0_i32, %c0_i32_0 : i32, i32
  }
  func.func @transform_6(%arg0: i32, %arg1: i32) -> (i32, i32) {
    %c0_i32 = arith.constant 0 : i32
    %c0_i32_0 = arith.constant 0 : i32
    %c0_i32_1 = arith.constant 0 : i32
    return %c0_i32, %c0_i32_0 : i32, i32
  }
  func.func @transform_7(%arg0: i32, %arg1: i32) -> (i32, i32) {
    %c0_i32 = arith.constant 0 : i32
    %c0_i32_0 = arith.constant 0 : i32
    %c0_i32_1 = arith.constant 0 : i32
    return %c0_i32, %c0_i32_0 : i32, i32
  }
  func.func @transform_8(%arg0: i32, %arg1: i32) -> (i32, i32, i32) {
    %c0_i32 = arith.constant 0 : i32
    %c0_i32_0 = arith.constant 0 : i32
    return %arg0, %arg1, %c0_i32 : i32, i32, i32
  }
}

</mosaic_0001>

<bundles_post_ra>
// kernel: tpu_custom_call.1
= control target key start
LH: loop header
LB: loop body
LE: loop exit
PB: predicated region body
PF: predicated region fallthrough
CT: control target
= control target key end

     0   :  { %s2107_s0 = inlined_call_operand.hbm [shape: bf16[2,8,128], index: 0, kind: input, shape index: {}]   ;;  %s2108_s1 = inlined_call_operand.hbm [shape: f32[2,1,512], index: 1, kind: input, shape index: {}]   ;;  %s2109_s2 = inlined_call_operand.hbm [shape: f32[2,8,128], index: 2, kind: input, shape index: {}]   ;;  %s2110_s3 = inlined_call_operand.hbm [shape: bf16[128,512], index: 3, kind: input, shape index: {}]   ;;  %s2111_s4 = inlined_call_operand.hbm [shape: bf16[512,128], index: 4, kind: input, shape index: {}]   ;;  %s2112_s5 = inlined_call_operand.vmem [shape: f32[1,128], index: 5, kind: input, shape index: {}]   ;;  %s2113_s6 = inlined_call_operand.vmem [shape: f32[1,128], index: 6, kind: input, shape index: {}]   ;;  %s2114_s7 = inlined_call_operand.vmem [shape: f32[1,128], index: 7, kind: input, shape index: {}]   ;;  %s2115_s8 = inlined_call_operand.vmem [shape: f32[2,8,1], index: 8, kind: output, shape index: {}]  }
   0x1   :  { %2120 = sst [smem:[#allocation17_spill]] %s2108_s1 }
   0x2   :  { %2121 = sst [smem:[#allocation18_spill]] %s2110_s3 }
   0x3   :  { %2122 = sst [smem:[#allocation19_spill]] %s2111_s4 }
   0x4   :  { %2123 = sst [smem:[#allocation20_spill]] %s2114_s7 }
   0x5   :  { %2124 = sst [smem:[#allocation21_spill]] %s2115_s8 }
   0x6   :  { %13 = vsyncpa [#allocation3], 0 }
   0x7   :  { %15 = vsyncpa [#allocation3 + $0x1], 0 }
   0x8   :  { %16 = vsyncpa [#allocation5], 0 }
   0x9   :  { %18 = vsyncpa [#allocation5 + $0x1], 0 }
   0xa   :  { %19 = vsyncpa [#allocation8], 0  ;;  %s1939_s27 = smov 0   ;;  %s1941_s28 = smov 0  }
   0xb   :  { %s1943_s29 = smov 0   ;;  %s1945_s30 = smov 0  }
   0xc   :  { %s1947_s9 = smov 0   ;;  %s1949_s10 = smov 0  }
   0xd LB: > { %2125 = sst [smem:[#allocation13_spill]] %s1874_s29  ;;  %s2116_s11 = sadd.s32 4294967295, %s1886_s10   ;;  %s1886_s10 = sphi %s1949_s10, %s25_s10   ;;  %s1882_s9 = sphi %s1947_s9, %s2147_s9   ;;  %s1878_s30 = sphi %s1945_s30, %s2146_s30   ;;  %s1874_s29 = sphi %s1943_s29, %s2142_s29   ;;  %s1870_s28 = sphi %s1941_s28, %s2145_s28   ;;  %s1866_s27 = sphi %s1939_s27, %s2144_s27  }
   0xe   : > { %2126 = sst [smem:[#allocation14_spill]] %s1878_s30  ;;  %p1238_p0 = scmp.ge.s32.totalorder %s1886_s10, 1 }
   0xf   : > { %p1973_p1 = scmp.eq.s32.totalorder %s2116_s11, 0  ;;  %p257_p2 = scmp.lt.s32.totalorder %s1886_s10, 3 }
  0x10   : > { %s2128_s3 = sld [smem:[#allocation18_spill]]  ;;  %s1888_s17 = smov [#allocation7]  }
  0x11   : > { %p1981_p3 = pnand %p1238_p0, %p257_p2  ;;  %s270_s18 = sshll.u32 %s1888_s17, 4  ;;  %s271_s18 = int_to_ptr.vmem [resolvable:$true] %s270_s18 }
  0x12   : > { %s1889_s20 = smov 256   ;;  %s1890_s21 = smov 16  }
  0x13   : > { %p1591_p4 = pneg %p1981_p3  ;;  %s37_s22 = sadd.s32 1, %s1882_s9 }
  0x14   : > { %p39_p6 = scmp.ge.s32.totalorder %s37_s22, 2  ;;  %s46_s23 = sadd.s32 1, %s1874_s29 }
  0x15   : > { %p1989_p5 = pnand %p1591_p4, %p1973_p1  ;;  %p53_p7 = scmp.ne.s32.totalorder %s1874_s29, %s1870_s28 }
  0x16   : > { %s268_s15 = sshll.u32 %s2128_s3, 4  ;;  %p54_p8 = scmp.eq.s32.totalorder %s1886_s10, 0  ;;  %s269_s15 = int_to_ptr.hbm [resolvable:$true] %s268_s15 }
  0x17   : > { %1594 = dma.hbm_to_vmem [thread:$0]  (!%p1989_p5), %s269_s15, 4096, %s271_s18, [#allocation8], %s1889_s20, %s1889_s20, %s1890_s21  }
  0x18   : > { %s2149_s22 = smov (%p39_p6, %s37_s22), 0  ;;  %p55_p9 = por %p54_p8, %p53_p7 }
  0x19   : > { %2131 = sst [smem:[#allocation15_spill]] %s2149_s22  ;;  %p59_p10 = scmp.ne.s32.totalorder %s1870_s28, %s1866_s27 }
  0x1a   : > { %s41_s24 = ssub.s32 %s1882_s9, %s2149_s22  ;;  %p1610_p11 = scmp.lt.s32.totalorder %s1886_s10, 2 }
  0x1b   : > { %p44_p12 = scmp.eq.s32.totalorder %s41_s24, 0  ;;  %p2009_p13 = por %p1973_p1, %p59_p10 }
  0x1c   : > { %s2014_s26 = sand.u32 1, %s1874_s29   ;;  %s1243_s13 = sshll.u32 %s1882_s9, 2 }
  0x1d   : > { %s2018_s14 = scalar_select %p44_p12, %s1874_s29, %s46_s23  }
  0x1e   : > { %s1242_s15 = sshll.u32 %s2014_s26, 2  ;;  %p2021_p0 = pnand %p1610_p11, %p55_p9 }
  0x1f   : > { %2133 = sst [smem:[#allocation16_spill]] %s2018_s14  ;;  %s327_s27 = sand.u32 1, %s1886_s10  }
  0x20   : > { %s2135_s1 = sld [smem:[#allocation17_spill]]  ;;  %s331_s24 = scalar_lea.vmem [#allocation4], %s1242_s15 }
  0x21   : > { %s339_s11 = sshll.u32 %s331_s24, 4  ;;  %s2136_s4 = sld [smem:[#allocation19_spill]]  ;;  %s340_s11 = int_to_ptr.vmem [resolvable:$true] %s339_s11 }
  0x22   : > { %s328_s29 = scalar_lea.sflag [#allocation5], %s327_s27  ;;  %s1891_s18 = smov [#allocation9]  }
  0x23   : > { %s284_s20 = sshll.u32 %s1891_s18, 4  ;;  %s1893_s24 = smov 4   ;;  %s285_s20 = int_to_ptr.vmem [resolvable:$true] %s284_s20 }
  0x24   : > { %s316_s22 = scalar_lea.hbm %s2107_s0, %s1243_s13  ;;  %s311_s23 = scalar_lea.vmem [#allocation2], %s1242_s15 }
  0x25   : > { %s320_s27 = sshll.u32 %s311_s23, 4  ;;  %s1247_s18 = sshll.u32 %s1882_s9, 3  ;;  %s321_s27 = int_to_ptr.vmem [resolvable:$true] %s320_s27 }
  0x26   : > { %s335_s21 = scalar_lea.hbm %s2135_s1, %s1243_s13  ;;  %s1892_s1 = smov 64  }
  0x27   : > { %s337_s3 = sshll.u32 %s335_s21, 4  ;;  %s282_s14 = sshll.u32 %s2136_s4, 4  ;;  %s338_s3 = int_to_ptr.hbm [resolvable:$true] %s337_s3  ;;  %s283_s14 = int_to_ptr.hbm [resolvable:$true] %s282_s14 }
  0x28   : > { %1604 = dma.hbm_to_vmem [thread:$0]  (!%p2021_p0), %s338_s3, 64, %s340_s11, %s328_s29  }
  0x29   : > { %1597 = dma.hbm_to_vmem [thread:$0]  (!%p1989_p5), %s283_s14, 4096, %s285_s20, [#allocation8], %s1892_s1, %s1892_s1, %s1893_s24  }
  0x2a   : > { %s318_s4 = sshll.u32 %s316_s22, 4  ;;  %s1246_s3 = sshll.u32 %s2014_s26, 3  ;;  %s319_s4 = int_to_ptr.hbm [resolvable:$true] %s318_s4 }
  0x2b   : > { %s308_s11 = scalar_lea.sflag [#allocation3], %s2014_s26  ;;  %s355_s19 = scalar_lea.hbm %s2109_s2, %s1247_s18 }
  0x2c   : > { %1601 = dma.hbm_to_vmem [thread:$0]  (!%p2021_p0), %s319_s4, 64, %s321_s27, %s308_s11  }
  0x2d   : > { %s350_s1 = scalar_lea.vmem [#allocation6], %s1246_s3  ;;  %s357_s20 = sshll.u32 %s355_s19, 4  ;;  %s358_s20 = int_to_ptr.hbm [resolvable:$true] %s357_s20 }
  0x2e   : > { %s359_s14 = sshll.u32 %s350_s1, 4  ;;  %368 = sbr.rel (%p1981_p3) target bundleno = 537 (0x219), region = 52  ;;  %s360_s14 = int_to_ptr.vmem [resolvable:$true] %s359_s14 }
  0x2f   : > { %1607 = dma.hbm_to_vmem [thread:$0]  (!%p2021_p0), %s358_s20, 128, %s360_s14, %s328_s29  }
  0x30   : > { %s370_s8 = sand.u32 (!%p1981_p3), 1, %s1870_s28  }
  0x31   : > { %s1249_s26 = sshll.u32 (!%p1981_p3), %s370_s8, 2  ;;  %s371_s4 = scalar_lea.sflag (!%p1981_p3), [#allocation3], %s370_s8 }
  0x32   : > { %s2052_s13 = scalar_lea.vmem (!%p1981_p3), [#allocation2], %s1249_s26 }
  0x33   : > { %1853 = dma.done.wait (%p2009_p13), %s371_s4, 64  }
  0x34   : > { %1855 = vsyncadd (%p2009_p13), %s371_s4, 4294967232  ;;  %s2137_s7 = sadd.s32 4294967295, %s1886_s10   ;;  %s2060_s15 = scalar_lea.vmem [#allocation4], %s1249_s26 }
  0x35   : > { %s380_s30 = sand.u32 1, %s2137_s7  }
  0x36   : > { %s381_s29 = scalar_lea.sflag [#allocation5], %s380_s30 }
  0x37   : > { %1857 = dma.done.wait (%p2009_p13), %s381_s29, 192  }
  0x38   : > { %1859 = vsyncadd (%p2009_p13), %s381_s29, 4294967104  ;;  %s1251_s16 = sshll.u32 %s370_s8, 3 }
  0x39   : > { %s2066_s17 = scalar_lea.vmem [#allocation6], %s1251_s16 }
  0x3a   : > { %1861 = dma.done.wait (%p1973_p1), [#allocation8], 8192  }
  0x3b   : > { %1863 = vsyncadd (%p1973_p1), [#allocation8], 4294959104  ;;  %v1369_v0 = vld [vmem:[#allocation7 + $0xe0] sm:$0xf]  ;;  %v1543_v1 = vld [vmem:[#allocation7 + $0xec] sm:$0xf0] }
  0x3c   : > { %v1541_v2 = vld [vmem:[#allocation7 + $0xe4] sm:$0xf]  ;;  %v1370_v3 = vor.u32 %v1543_v1, %v1369_v0  ;;  %v1371_v4 = vld [vmem:[#allocation7 + $0xf0] sm:$0xf0]  ;;  %v1377_v5 = vld [vmem:[#allocation7 + $0xe8] sm:$0xf] }
  0x3d   : > { %v1544_v6 = vld [vmem:[#allocation7 + $0xf4] sm:$0xf0]  ;;  %v1374_v7 = vor.u32 %v1541_v2, %v1371_v4  ;;  %v1542_v9 = vld [vmem:[#allocation7 + $0xec] sm:$0xf]  ;;  %v1379_v10 = vld [vmem:[#allocation7 + $0xf8] sm:$0xf0] }
  0x3e   : > { %v1378_v8 = vor.u32 %v1544_v6, %v1377_v5  ;;  %v1353_v11 = vld [vmem:[#allocation7 + $0xc0] sm:$0xf]  ;;  %660 = vmatpush.bf16.msra.mxu0 %v1370_v3  ;;  %v1382_v12 = vor.u32 %v1542_v9, %v1379_v10  ;;  %v1539_v13 = vld [vmem:[#allocation7 + $0xcc] sm:$0xf0]  ;;  %v1537_v14 = vld [vmem:[#allocation7 + $0xc4] sm:$0xf] }
  0x3f   : > { %v1355_v15 = vld [vmem:[#allocation7 + $0xd0] sm:$0xf0]  ;;  %673 = vmatpush.bf16.msra.mxu1 %v1374_v7  ;;  %v1354_v16 = vor.u32 %v1539_v13, %v1353_v11  ;;  %v1361_v18 = vld [vmem:[#allocation7 + $0xc8] sm:$0xf]  ;;  %v1540_v19 = vld [vmem:[#allocation7 + $0xd4] sm:$0xf0] }
  0x40   : > { %686 = vmatpush.bf16.msra.mxu2 %v1378_v8  ;;  %v1358_v17 = vor.u32 %v1537_v14, %v1355_v15  ;;  %v1538_v20 = vld [vmem:[#allocation7 + $0xcc] sm:$0xf]  ;;  %699 = vmatpush.bf16.msra.mxu3 %v1382_v12  ;;  %v1362_v21 = vor.u32 %v1540_v19, %v1361_v18  ;;  %v1363_v22 = vld [vmem:[#allocation7 + $0xd8] sm:$0xf0]  ;;  %v1337_v23 = vld [vmem:[#allocation7 + $0xa0] sm:$0xf] }
  0x41   : > { %v1535_v24 = vld [vmem:[#allocation7 + $0xac] sm:$0xf0]  ;;  %v1366_v25 = vor.u32 %v1538_v20, %v1363_v22  ;;  %v1533_v26 = vld [vmem:[#allocation7 + $0xa4] sm:$0xf]  ;;  %v1339_v27 = vld [vmem:[#allocation7 + $0xb0] sm:$0xf0] }
  0x42   : > { %v1345_v28 = vld [vmem:[#allocation7 + $0xa8] sm:$0xf]  ;;  %661 = vmatpush.bf16.msra.mxu0 %v1354_v16  ;;  %v1338_v29 = vor.u32 %v1535_v24, %v1337_v23  ;;  %v1536_v30 = vld [vmem:[#allocation7 + $0xb4] sm:$0xf0]  ;;  %v1534_v31 = vld [vmem:[#allocation7 + $0xac] sm:$0xf]  ;;  %v1342_v33 = vor.u32 %v1533_v26, %v1339_v27 }
  0x43   : > { %v1347_v32 = vld [vmem:[#allocation7 + $0xb8] sm:$0xf0]  ;;  %674 = vmatpush.bf16.msra.mxu1 %v1358_v17  ;;  %v1346_v34 = vor.u32 %v1536_v30, %v1345_v28  ;;  %v1321_v35 = vld [vmem:[#allocation7 + $0x80] sm:$0xf]  ;;  %v1531_v36 = vld [vmem:[#allocation7 + $0x8c] sm:$0xf0] }
  0x44   : > { %687 = vmatpush.bf16.msra.mxu2 %v1362_v21  ;;  %v1529_v37 = vld [vmem:[#allocation7 + $0x84] sm:$0xf]  ;;  %700 = vmatpush.bf16.msra.mxu3 %v1366_v25  ;;  %v1350_v38 = vor.u32 %v1534_v31, %v1347_v32  ;;  %v1323_v39 = vld [vmem:[#allocation7 + $0x90] sm:$0xf0]  ;;  %v1329_v40 = vld [vmem:[#allocation7 + $0x88] sm:$0xf]  ;;  %v1322_v44 = vor.u32 %v1531_v36, %v1321_v35 }
  0x45   : > { %v1532_v41 = vld [vmem:[#allocation7 + $0x94] sm:$0xf0]  ;;  %v1530_v42 = vld [vmem:[#allocation7 + $0x8c] sm:$0xf]  ;;  %v1331_v43 = vld [vmem:[#allocation7 + $0x98] sm:$0xf0]  ;;  %v1326_v45 = vor.u32 %v1529_v37, %v1323_v39 }
  0x46   : > { %662 = vmatpush.bf16.msra.mxu0 %v1338_v29  ;;  %v1330_v46 = vor.u32 %v1532_v41, %v1329_v40  ;;  %v1305_v47 = vld [vmem:[#allocation7 + $0x60] sm:$0xf]  ;;  %v1527_v48 = vld [vmem:[#allocation7 + $0x6c] sm:$0xf0]  ;;  %v1525_v49 = vld [vmem:[#allocation7 + $0x64] sm:$0xf]  ;;  %v1334_v50 = vor.u32 %v1530_v42, %v1331_v43 }
  0x47   : > { %675 = vmatpush.bf16.msra.mxu1 %v1342_v33  ;;  %v1307_v51 = vld [vmem:[#allocation7 + $0x70] sm:$0xf0]  ;;  %v1313_v52 = vld [vmem:[#allocation7 + $0x68] sm:$0xf]  ;;  %v1528_v53 = vld [vmem:[#allocation7 + $0x74] sm:$0xf0]  ;;  %v1306_v56 = vor.u32 %v1527_v48, %v1305_v47 }
  0x48   : > { %688 = vmatpush.bf16.msra.mxu2 %v1346_v34  ;;  %701 = vmatpush.bf16.msra.mxu3 %v1350_v38  ;;  %v1526_v54 = vld [vmem:[#allocation7 + $0x6c] sm:$0xf]  ;;  %v1315_v55 = vld [vmem:[#allocation7 + $0x78] sm:$0xf0]  ;;  %v1310_v57 = vor.u32 %v1525_v49, %v1307_v51  ;;  %v1314_v58 = vor.u32 %v1528_v53, %v1313_v52  ;;  %v1289_v59 = vld [vmem:[#allocation7 + $0x40] sm:$0xf] }
  0x49   : > { %v1523_v60 = vld [vmem:[#allocation7 + $0x4c] sm:$0xf0]  ;;  %v1521_v61 = vld [vmem:[#allocation7 + $0x44] sm:$0xf]  ;;  %v1318_v62 = vor.u32 %v1526_v54, %v1315_v55  ;;  %v1291_v63 = vld [vmem:[#allocation7 + $0x50] sm:$0xf0] }
  0x4a   : > { %663 = vmatpush.bf16.msra.mxu0 %v1322_v44  ;;  %v1297_v0 = vld [vmem:[#allocation7 + $0x48] sm:$0xf]  ;;  %v1524_v1 = vld [vmem:[#allocation7 + $0x54] sm:$0xf0]  ;;  %v1522_v2 = vld [vmem:[#allocation7 + $0x4c] sm:$0xf]  ;;  %v1290_v4 = vor.u32 %v1523_v60, %v1289_v59  ;;  %v1294_v5 = vor.u32 %v1521_v61, %v1291_v63 }
  0x4b   : > { %676 = vmatpush.bf16.msra.mxu1 %v1326_v45  ;;  %v1299_v3 = vld [vmem:[#allocation7 + $0x58] sm:$0xf0]  ;;  %v1298_v6 = vor.u32 %v1524_v1, %v1297_v0  ;;  %v1273_v7 = vld [vmem:[#allocation7 + $0x20] sm:$0xf]  ;;  %v1519_v8 = vld [vmem:[#allocation7 + $0x2c] sm:$0xf0] }
  0x4c   : > { %689 = vmatpush.bf16.msra.mxu2 %v1330_v46  ;;  %702 = vmatpush.bf16.msra.mxu3 %v1334_v50  ;;  %v1517_v9 = vld [vmem:[#allocation7 + $0x24] sm:$0xf]  ;;  %v1302_v10 = vor.u32 %v1522_v2, %v1299_v3  ;;  %v1275_v11 = vld [vmem:[#allocation7 + $0x30] sm:$0xf0]  ;;  %v1281_v12 = vld [vmem:[#allocation7 + $0x28] sm:$0xf]  ;;  %v1274_v16 = vor.u32 %v1519_v8, %v1273_v7 }
  0x4d   : > { %v1520_v13 = vld [vmem:[#allocation7 + $0x34] sm:$0xf0]  ;;  %v1518_v14 = vld [vmem:[#allocation7 + $0x2c] sm:$0xf]  ;;  %v1283_v15 = vld [vmem:[#allocation7 + $0x38] sm:$0xf0]  ;;  %v1278_v17 = vor.u32 %v1517_v9, %v1275_v11 }
  0x4e   : > { %664 = vmatpush.bf16.msra.mxu0 %v1306_v56  ;;  %v1282_v18 = vor.u32 %v1520_v13, %v1281_v12  ;;  %v1257_v19 = vld [vmem:[#allocation7] sm:$0xf]  ;;  %v1515_v20 = vld [vmem:[#allocation7 + $0xc] sm:$0xf0]  ;;  %v1513_v21 = vld [vmem:[#allocation7 + $0x4] sm:$0xf]  ;;  %v1286_v22 = vor.u32 %v1518_v14, %v1283_v15 }
  0x4f   : > { %677 = vmatpush.bf16.msra.mxu1 %v1310_v57  ;;  %v1259_v23 = vld [vmem:[#allocation7 + $0x10] sm:$0xf0]  ;;  %v1265_v24 = vld [vmem:[#allocation7 + $0x8] sm:$0xf]  ;;  %v1516_v25 = vld [vmem:[#allocation7 + $0x14] sm:$0xf0]  ;;  %v1258_v28 = vor.u32 %v1515_v20, %v1257_v19 }
  0x50   : > { %690 = vmatpush.bf16.msra.mxu2 %v1314_v58  ;;  %703 = vmatpush.bf16.msra.mxu3 %v1318_v62  ;;  %v1514_v26 = vld [vmem:[#allocation7 + $0xc] sm:$0xf]  ;;  %v1267_v27 = vld [vmem:[#allocation7 + $0x18] sm:$0xf0]  ;;  %v1262_v29 = vor.u32 %v1513_v21, %v1259_v23  ;;  %v1266_v30 = vor.u32 %v1516_v25, %v1265_v24  ;;  %v457_v34 = vld [vmem:[%s2052_s13] sm:$0xf] }
  0x51   : > { %v1270_v31 = vor.u32 %v1514_v26, %v1267_v27  ;;  %v1552_v32 = vld [vmem:[#allocation9 + $0x38] sm:$0xff]  ;;  %v1551_v36 = vld [vmem:[#allocation9 + $0x30] sm:$0xff]  ;;  %v1550_v40 = vld [vmem:[#allocation9 + $0x28] sm:$0xff]  ;;  %s2138_s27 = sld [smem:[#allocation20_spill]]  ;;  %vm1087_vm6 = vcmask 7168  }
  0x52   : > { %665 = vmatpush.bf16.msra.mxu0 %v1290_v4  ;;  %v1560_v33 = vld [vmem:[#allocation9 + $0x78] sm:$0xff]  ;;  %v1559_v38 = vld [vmem:[#allocation9 + $0x70] sm:$0xff]  ;;  %v1558_v42 = vld [vmem:[#allocation9 + $0x68] sm:$0xff]  ;;  %s2139_s3 = sld [smem:[#allocation14_spill]] }
  0x53   : > { %678 = vmatpush.bf16.msra.mxu1 %v1294_v5  ;;  %v1568_v35 = vld [vmem:[#allocation9 + $0xb8] sm:$0xff]  ;;  %v1567_v39 = vld [vmem:[#allocation9 + $0xb0] sm:$0xff]  ;;  %v1566_v43 = vld [vmem:[#allocation9 + $0xa8] sm:$0xff]  ;;  %s2140_s1 = sld [smem:[#allocation21_spill]] }
  0x54   : > { %691 = vmatpush.bf16.msra.mxu2 %v1298_v6  ;;  %704 = vmatpush.bf16.msra.mxu3 %v1302_v10  ;;  %v1576_v37 = vld [vmem:[#allocation9 + $0xf8] sm:$0xff]  ;;  %v1575_v41 = vld [vmem:[#allocation9 + $0xf0] sm:$0xff]  ;;  %v1549_v44 = vld [vmem:[#allocation9 + $0x20] sm:$0xff] }
  0x55   : > { %v1574_v45 = vld [vmem:[#allocation9 + $0xe8] sm:$0xff]  ;;  %v1557_v46 = vld [vmem:[#allocation9 + $0x60] sm:$0xff]  ;;  %v1548_v48 = vld [vmem:[#allocation9 + $0x18] sm:$0xff] }
  0x56   : > { %666 = vmatpush.bf16.msra.mxu0 %v1274_v16  ;;  %v1565_v47 = vld [vmem:[#allocation9 + $0xa0] sm:$0xff]  ;;  %v1556_v50 = vld [vmem:[#allocation9 + $0x58] sm:$0xff]  ;;  %v1547_v51 = vld [vmem:[#allocation9 + $0x10] sm:$0xff] }
  0x57   : > { %679 = vmatpush.bf16.msra.mxu1 %v1278_v17  ;;  %v1573_v49 = vld [vmem:[#allocation9 + $0xe0] sm:$0xff]  ;;  %v1555_v52 = vld [vmem:[#allocation9 + $0x50] sm:$0xff]  ;;  %v1564_v53 = vld [vmem:[#allocation9 + $0x98] sm:$0xff] }
  0x58   : > { %692 = vmatpush.bf16.msra.mxu2 %v1282_v18  ;;  %705 = vmatpush.bf16.msra.mxu3 %v1286_v22  ;;  %v1572_v54 = vld [vmem:[#allocation9 + $0xd8] sm:$0xff]  ;;  %v1546_v55 = vld [vmem:[#allocation9 + $0x8] sm:$0xff]  ;;  %v1563_v57 = vld [vmem:[#allocation9 + $0x90] sm:$0xff]  ;;  %p450_p1 = scmp.lt.s32.totalorder %s2139_s3, 1 }
  0x59   : > { %v1554_v56 = vld [vmem:[#allocation9 + $0x48] sm:$0xff]  ;;  %v1571_v58 = vld [vmem:[#allocation9 + $0xd0] sm:$0xff]  ;;  %v1545_v59 = vld [vmem:[#allocation9] sm:$0xff] }
  0x5a   : > { %667 = vmatpush.bf16.msra.mxu0 %v1258_v28  ;;  %v1553_v60 = vld [vmem:[#allocation9 + $0x40] sm:$0xff]  ;;  %v1562_v61 = vld [vmem:[#allocation9 + $0x88] sm:$0xff]  ;;  %s2151_s3 = smov (!%p450_p1, %s2139_s3), 1 }
  0x5b   : > { %680 = vmatpush.bf16.msra.mxu1 %v1262_v29  ;;  %v1570_v62 = vld [vmem:[#allocation9 + $0xc8] sm:$0xff]  ;;  %v1561_v63 = vld [vmem:[#allocation9 + $0x80] sm:$0xff]  ;;  %s1254_s11 = sshll.u32 %s2151_s3, 3 }
  0x5c   : > { %693 = vmatpush.bf16.msra.mxu2 %v1266_v30  ;;  %706 = vmatpush.bf16.msra.mxu3 %v1270_v31  ;;  %v1569_v0 = vld [vmem:[#allocation9 + $0xc0] sm:$0xff]  ;;  %v490_v1 = vld [vmem:[%s2060_s15] sm:$0xf]  ;;  %s456_s14 = scalar_lea.vmem %s2140_s1, %s1254_s11 }
  0x5d   : > { %668 = vmatmul.bf16.vlgmr.msra.gmra.mxu0 %v457_v34  ;;  %v492_v2 = vperm.slane %v490_v1, 0  ;;  %v493_v3 = vperm.slane %v490_v1, 1  ;;  %v494_v10 = vperm.slane %v490_v1, 2  ;;  %v495_v12 = vperm.slane %v490_v1, 3 }
  0x5e   : > { %984 = vmatpush.bf16.msrb.mxu0 %v1552_v32  ;;  %681 = vmatmul.bf16.vlgmr.msra.gmra.mxu1 %v457_v34  ;;  %v1667_v32 = vld [vmem:[%s2112_s5] ss:$0 sm:$0xff] }
  0x5f   : > { %997 = vmatpush.bf16.msrb.mxu1 %v1560_v33  ;;  %694 = vmatmul.bf16.vlgmr.msra.gmra.mxu2 %v457_v34  ;;  %v1668_v33 = vld [vmem:[%s2113_s6] ss:$0 sm:$0xff] }
  0x60   : > { %707 = vmatmul.bf16.vlgmr.msra.gmra.mxu3 %v457_v34  ;;  %1010 = vmatpush.bf16.msrb.mxu2 %v1568_v35  ;;  %v1036_v34 = vld [vmem:[%s2066_s17] sm:$0xff] }
  0x61   : > { %1023 = vmatpush.bf16.msrb.mxu3 %v1576_v37 }
  0x62   : > { %985 = vmatpush.bf16.msrb.mxu0 %v1551_v36 }
  0x63   : > { %998 = vmatpush.bf16.msrb.mxu1 %v1559_v38  ;;  %v1041_v38 = vmul.f32 %v1668_v33, %v1036_v34 }
  0x64   : > { %1011 = vmatpush.bf16.msrb.mxu2 %v1567_v39  ;;  %v1669_v39 = vld [vmem:[%s2138_s27] ss:$0 sm:$0xff] }
  0x65   : > { %1024 = vmatpush.bf16.msrb.mxu3 %v1575_v41 }
  0x66   : > { %986 = vmatpush.bf16.msrb.mxu0 %v1550_v40 }
  0x67   : > { %999 = vmatpush.bf16.msrb.mxu1 %v1558_v42 }
  0x68   : > { %1012 = vmatpush.bf16.msrb.mxu2 %v1566_v43 }
  0x69   : > { %1025 = vmatpush.bf16.msrb.mxu3 %v1574_v45 }
  0x6a   : > { %987 = vmatpush.bf16.msrb.mxu0 %v1549_v44  ;;  %v1046_v44 = vadd.f32 %v1669_v39, %v1041_v38 }
  0x6b   : > { %1000 = vmatpush.bf16.msrb.mxu1 %v1557_v46 }
  0x6c   : > { %1013 = vmatpush.bf16.msrb.mxu2 %v1565_v47 }
  0x6d   : > { %1026 = vmatpush.bf16.msrb.mxu3 %v1573_v49 }
  0x6e   : > { %988 = vmatpush.bf16.msrb.mxu0 %v1548_v48 }
  0x6f   : > { %1001 = vmatpush.bf16.msrb.mxu1 %v1556_v50  ;;  %v1053_v50 = vmul.f32 %v1046_v44, %v1046_v44 }
  0x70   : > { %1014 = vmatpush.bf16.msrb.mxu2 %v1564_v53 }
  0x71   : > { %1027 = vmatpush.bf16.msrb.mxu3 %v1572_v54 }
  0x72   : > { %989 = vmatpush.bf16.msrb.mxu0 %v1547_v51 }
  0x73   : > { %1002 = vmatpush.bf16.msrb.mxu1 %v1555_v52 }
  0x74   : > { %1015 = vmatpush.bf16.msrb.mxu2 %v1563_v57 }
  0x75   : > { %1028 = vmatpush.bf16.msrb.mxu3 %v1571_v58 }
  0x76   : > { %990 = vmatpush.bf16.msrb.mxu0 %v1546_v55 }
  0x77   : > { %1003 = vmatpush.bf16.msrb.mxu1 %v1554_v56 }
  0x78   : > { %1016 = vmatpush.bf16.msrb.mxu2 %v1562_v61 }
  0x79   : > { %1029 = vmatpush.bf16.msrb.mxu3 %v1570_v62 }
  0x7a   : > { %991 = vmatpush.bf16.msrb.mxu0 %v1545_v59 }
  0x7b   : > { %1004 = vmatpush.bf16.msrb.mxu1 %v1553_v60 }
  0x7c   : > { %1017 = vmatpush.bf16.msrb.mxu2 %v1561_v63 }
  0x7d   : > { %1030 = vmatpush.bf16.msrb.mxu3 %v1569_v0 }
  0xda   : > { %v669_v4 = vpop.f32.mrf.mxu0 }
  0xdb   : > { %v670_v5 = vadd.f32 %v669_v4, %v492_v2  ;;  %v682_v6 = vpop.f32.mrf.mxu1 }
  0xdc   : > { %v683_v7 = vadd.f32 %v682_v6, %v493_v3 }
  0xdd   : > { %v712_v8 = vmul.f32 0.01, %v670_v5 }
  0xde   : > { %v713_v9 = vmul.f32 0.01, %v683_v7 }
  0xdf   : > { %v716_v11 = vmax.f32 %v670_v5, %v712_v8 }
  0xe0   : > { %v717_v13 = vmax.f32 %v683_v7, %v713_v9 }
  0xe1   : > { %v720_v14 = vpack.c.bf16 %v716_v11, %v716_v11 }
  0xe2   : > { %v695_v15 = vpop.f32.mrf.mxu2  ;;  %v721_v16 = vpack.c.bf16 %v717_v13, %v717_v13  ;;  %v671_v19 = vpop.f32.mrf.mxu0 }
  0xe3   : > { %v696_v17 = vadd.f32 %v695_v15, %v494_v10  ;;  %v708_v18 = vpop.f32.mrf.mxu3  ;;  %992 = vmatmul.bf16.vlgmr.msrb.gmra.mxu0 %v720_v14  ;;  %v684_v21 = vpop.f32.mrf.mxu1 }
  0xe4   : > { %v709_v20 = vadd.f32 %v708_v18, %v495_v12  ;;  %1005 = vmatmul.bf16.vlgmr.msrb.gmra.mxu1 %v721_v16 }
  0xe5   : > { %v714_v22 = vmul.f32 0.01, %v696_v17 }
  0xe6   : > { %v715_v23 = vmul.f32 0.01, %v709_v20 }
  0xe7   : > { %v718_v24 = vmax.f32 %v696_v17, %v714_v22 }
  0xe8   : > { %v719_v25 = vmax.f32 %v709_v20, %v715_v23 }
  0xe9   : > { %v722_v26 = vpack.c.bf16 %v718_v24, %v718_v24 }
  0xea   : > { %v723_v27 = vpack.c.bf16 %v719_v25, %v719_v25  ;;  %v697_v28 = vpop.f32.mrf.mxu2 }
  0xeb   : > { %v710_v29 = vpop.f32.mrf.mxu3  ;;  %1018 = vmatmul.bf16.vlgmr.msrb.gmra.mxu2 %v722_v26 }
  0xec   : > { %1031 = vmatmul.bf16.vlgmr.msrb.gmra.mxu3 %v723_v27 }
 0x160   : > { %v993_v30 = vpop.f32.mrf.mxu0 }
 0x161   : > { %v1006_v31 = vpop.f32.mrf.mxu1  ;;  %v994_v35 = vadd.f32 %v1667_v32, %v993_v30 }
 0x163   : > { %v1007_v40 = vadd.f32 %v1006_v31, %v994_v35 }
 0x168   : > { %v995_v36 = vpop.f32.mrf.mxu0 }
 0x169   : > { %v1008_v37 = vpop.f32.mrf.mxu1 }
 0x16e   : > { %v1019_v41 = vpop.f32.mrf.mxu2 }
 0x16f   : > { %v1020_v42 = vadd.f32 %v1019_v41, %v1007_v40  ;;  %v1032_v43 = vpop.f32.mrf.mxu3 }
 0x171   : > { %v1033_v45 = vadd.f32 %v1032_v43, %v1020_v42 }
 0x173   : > { %v1050_v46 = vmul.f32 %v1033_v45, %v1033_v45  ;;  %v1047_v47 = vmul.f32 %v1046_v44, %v1033_v45 }
 0x175   : > { %1051 = vadd.xlane.f32.xlu0 %v1050_v46  ;;  %1048 = vadd.xlane.f32.xlu1 %v1047_v47 }
 0x176   : > { %v1021_v48 = vpop.f32.mrf.mxu2 }
 0x177   : > { %v1034_v49 = vpop.f32.mrf.mxu3 }
 0x17d   : > { %1054 = vadd.xlane.f32.xlu0 %v1053_v50 }
 0x1e8   : > { %v1052_v51 = vpop.xlane.xlu0 %1051  ;;  %v1049_v4 = vpop.xlane.xlu1 %1048 }
 0x1e9   : > { %1670 = vrsqrt.f32 %v1052_v51  ;;  %vm1062_vm2 = vweird.f32 %v1052_v51 }
 0x1ef   : > { %v1671_v52 = vpop.eup %1670 }
 0x1f0   : > { %v1057_v53 = vmul.f32 %v1671_v52, %v1052_v51  ;;  %v1055_v54 = vpop.xlane.xlu0 %1054  ;;  %vm1063_vm0 = vweird.f32 %v1671_v52 }
 0x1f1   : > { %1672 = vrsqrt.f32 %v1055_v54  ;;  %vm1064_vm3 = vmor %vm1062_vm2, %vm1063_vm0  ;;  %vm1072_vm4 = vweird.f32 %v1055_v54 }
 0x1f2   : > { %v1058_v55 = vmul.f32 %v1671_v52, %v1057_v53 }
 0x1f4   : > { %v1059_v56 = vmul.f32 0.5, %v1058_v55 }
 0x1f6   : > { %v1060_v59 = vsub.f32 1.5, %v1059_v56 }
 0x1f7   : > { %v1673_v57 = vpop.eup %1672 }
 0x1f8   : > { %v1067_v58 = vmul.f32 %v1673_v57, %v1055_v54  ;;  %v1061_v62 = vmul.f32 %v1671_v52, %v1060_v59  ;;  %vm1073_vm1 = vweird.f32 %v1673_v57 }
 0x1f9   : > { %vm1074_vm5 = vmor %vm1072_vm4, %vm1073_vm1 }
 0x1fa   : > { %v1068_v60 = vmul.f32 %v1673_v57, %v1067_v58  ;;  %v1065_v1 = vsel %vm1064_vm3, %v1671_v52, %v1061_v62 }
 0x1fc   : > { %v1069_v61 = vmul.f32 0.5, %v1068_v60 }
 0x1fe   : > { %v1070_v63 = vsub.f32 1.5, %v1069_v61 }
 0x200   : > { %v1071_v0 = vmul.f32 %v1673_v57, %v1070_v63 }
 0x202   : > { %v1075_v2 = vsel %vm1074_vm5, %v1673_v57, %v1071_v0 }
 0x203   : > { %v1076_v3 = vmul.f32 %v1075_v2, %v1065_v1 }
 0x205   : > { %v1077_v5 = vmul.f32 %v1076_v3, %v1049_v4 }
 0x207   : > { %v1078_v6 = vmul.f32 2.0, %v1077_v5  ;;  %v1081_v7 = vmul.f32 %v1077_v5, %v1077_v5 }
 0x209   : > { %v1082_v8 = vmul.f32 %v1081_v7, %v1077_v5  ;;  %v1079_v9 = vmul.f32 1.442695, %v1078_v6 }
 0x20b   : > { %v1083_v10 = vmul.f32 2.0, %v1082_v8  ;;  %1674 = vpow2.f32 %v1079_v9 }
 0x20d   : > { %v1084_v11 = vmul.f32 1.442695, %v1083_v10 }
 0x20f   : > { %1676 = vpow2.f32 %v1084_v11 }
 0x211   : > { %v1675_v12 = vpop.eup %1674 }
 0x215   : > { %v1677_v13 = vpop.eup %1676 }
 0x216   : > { %v1086_v14 = vadd.f32 %v1677_v13, %v1675_v12 }
 0x218   : > { %1088 = vst.msk [vmem:[%s456_s14] sm:$0xff] %vm1087_vm6, %v1086_v14 }
 0x219 PF: > { %s25_s10 = sadd.s32 1, %s1886_s10   ;;  %s2141_s20 = sld [smem:[#allocation13_spill]] }
 0x21a   : > { %p22_p2 = scmp.ge.s32.totalorder %s25_s10, 4   ;;  %s2142_s29 = sld [smem:[#allocation16_spill]] }
 0x21b   : > { %s2143_s8 = sld [smem:[#allocation15_spill]]  ;;  %s2144_s27 = smov %s1870_s28 }
 0x21c   : > { %s2146_s30 = smov %s1882_s9 }
 0x21d   :  { %24 = sbr.rel (!%p22_p2) target bundleno = 13 (0xd), region = 124 }
 0x21f   : > { %s2145_s28 = smov %s2141_s20 }
 0x221   : > { %s2147_s9 = smov %s2143_s8 }
 0x222   :  { %1114 = vsyncpa [#allocation3], 1 }
 0x223   :  { %1116 = vsyncpa [#allocation3 + $0x1], 1 }
 0x224   :  { %1117 = vsyncpa [#allocation5], 1 }
 0x225   :  { %1119 = vsyncpa [#allocation5 + $0x1], 1 }
 0x226   :  { %1120 = vsyncpa [#allocation8], 1 }

</bundles_post_ra>
